<compile_context>
chip_gen: v5e
topology: v5e:2x2
jax: 0.10.0
libtpu: 0.0.40
codegen_flags: <defaults>
</compile_context>

<pallas_src>
import functools

import jax
import jax.numpy as jnp
from jax.experimental import pallas as pl
from jax.experimental.pallas import tpu as pltpu


def _attention_block_kernel(gx_ref, wgx_ref, bgx_ref, wp_ref, bp_ref, o_ref, *, cg: int):
    # gx_ref:  (Cg+Cl, tm)    stacked [g ; x] tokens, channel-major (tokens on lanes)
    # wgx_ref: (f_int, Cg+Cl) fused conv+BN weight for both branches
    # bgx_ref: (f_int, 1)     combined bias (bg + bx)
    # wp_ref:  (f_int, 1)     psi projection weight (conv+BN folded)
    # bp_ref:  (1, 1)         psi projection bias
    # o_ref:   (Cl, tm)
    gx = gx_ref[...].astype(jnp.float32)                       # (Cg+Cl, tm), f32 math
    x_t = gx[cg:, :]                                           # (Cl, tm)

    # Fused projection of both branches: a single MXU pass instead of two.
    h = jnp.dot(wgx_ref[...], gx, preferred_element_type=jnp.float32) + bgx_ref[...]
    h = jnp.maximum(h, 0.0)                                    # ReLU, (f_int, tm)

    # psi: f_int -> 1 projection on VPU + sublane (XLU) reduce; keeps lanes dense,
    # avoids a 1-lane-wide MXU result.
    p = jnp.sum(h * wp_ref[...], axis=0, keepdims=True) + bp_ref[...]   # (1, tm)
    psi = jax.nn.sigmoid(p)                                    # exp on EUP; (1, tm)

    o_ref[...] = (psi * x_t).astype(o_ref.dtype)               # gate broadcast over channels


def attention_block_pallas(g, x, params, *, tm=2048, stream_dtype=jnp.bfloat16):
    """g: (N, f_g, H, W), x: (N, f_l, H, W) -> (N, f_l, H, W)."""
    N, Cg, H, W = g.shape
    _, Cl, _, _ = x.shape
    f_int = params["wgx"].shape[0]
    M = N * H * W

    sdt = jnp.dtype(stream_dtype) if stream_dtype is not None else jnp.dtype(x.dtype)
    itm = sdt.itemsize

    # Token tile: multiple of 128 lanes, clamped to the (128-rounded) token count.
    tm = max(128, (int(tm) // 128) * 128)
    tm = min(tm, pl.cdiv(M, 128) * 128)
    grid_m = pl.cdiv(M, tm)           # boundary tile handled by Pallas padding/masking

    # Channel-major flatten (leading-axis transpose only) + fused [g ; x] stack + cast.
    g_cm = jnp.transpose(g, (1, 0, 2, 3)).reshape(Cg, M)
    x_cm = jnp.transpose(x, (1, 0, 2, 3)).reshape(Cl, M)
    gx_cm = jnp.concatenate([g_cm, x_cm], axis=0).astype(sdt)  # (Cg+Cl, M)

    cost = pl.CostEstimate(
        flops=int(2 * M * (Cg + Cl) * f_int + 3 * M * f_int + 2 * M * Cl),
        transcendentals=int(M),
        bytes_accessed=int((Cg + 2 * Cl) * M * itm + (f_int * (Cg + Cl + 2) + 1) * 4),
    )

    out_cm = pl.pallas_call(
        functools.partial(_attention_block_kernel, cg=Cg),
        out_shape=jax.ShapeDtypeStruct((Cl, M), sdt),
        grid_spec=pltpu.PrefetchScalarGridSpec(
            num_scalar_prefetch=0,
            grid=(grid_m,),
            in_specs=[
                pl.BlockSpec((Cg + Cl, tm), lambda i: (0, i)),
                pl.BlockSpec((f_int, Cg + Cl), lambda i: (0, 0)),
                pl.BlockSpec((f_int, 1), lambda i: (0, 0)),
                pl.BlockSpec((f_int, 1), lambda i: (0, 0)),
                pl.BlockSpec((1, 1), lambda i: (0, 0)),
            ],
            out_specs=pl.BlockSpec((Cl, tm), lambda i: (0, i)),
        ),
        compiler_params=pltpu.CompilerParams(
            dimension_semantics=("parallel",),
            # Headroom for large token tiles with realistic channel counts, still well
            # under v7x's 64 MiB physical VMEM (v5e/v6e have 128 MiB physical).
            vmem_limit_bytes=48 * 1024 * 1024,
        ),
        cost_estimate=cost,
    )(gx_cm, params["wgx"], params["bgx"], params["wp_col"], params["bp_11"])

    out = jnp.transpose(out_cm.reshape(Cl, N, H, W), (1, 0, 2, 3))
    return out.astype(x.dtype)


def _fold_conv_bn(w, b_conv, gamma, beta, mean, var, eps=1e-5):
    """Fold eval-mode BatchNorm into a 1x1 conv expressed as a (C_in, C_out) matmul."""
    s = gamma / jnp.sqrt(var + eps)                   # (C_out,)
    w_fold = w * s[None, :]                           # (C_in, C_out)
    b_fold = (b_conv - mean) * s + beta               # (C_out,)
    return w_fold, b_fold


def init_params(key, f_g, f_l, f_int):
    ks = jax.random.split(key, 12)

    def u(k, shape, scale=0.5):
        return jax.random.uniform(k, shape, jnp.float32, -scale, scale)

    # w_g branch: Conv2d(f_g, f_int, 1) + BN(f_int)
    wg = u(ks[0], (f_g, f_int)); bg = u(ks[1], (f_int,))
    gamma_g = 1.0 + u(ks[2], (f_int,), 0.1); beta_g = u(ks[3], (f_int,), 0.1)
    mean_g = u(ks[4], (f_int,), 0.1); var_g = 1.0 + jnp.abs(u(ks[5], (f_int,), 0.1))
    # w_x branch: Conv2d(f_l, f_int, 1) + BN(f_int)
    wx = u(ks[6], (f_l, f_int)); bx = u(ks[7], (f_int,))
    gamma_x = 1.0 + u(ks[8], (f_int,), 0.1); beta_x = u(ks[9], (f_int,), 0.1)
    mean_x = jnp.zeros((f_int,)); var_x = jnp.ones((f_int,))
    # psi branch: Conv2d(f_int, 1, 1) + BN(1)
    wp = u(ks[10], (f_int, 1)); bp = u(ks[11], (1,))
    gamma_p = jnp.ones((1,)); beta_p = jnp.zeros((1,))
    mean_p = jnp.zeros((1,)); var_p = jnp.ones((1,))

    wg_f, bg_f = _fold_conv_bn(wg, bg, gamma_g, beta_g, mean_g, var_g)  # (f_g,f_int),(f_int,)
    wx_f, bx_f = _fold_conv_bn(wx, bx, gamma_x, beta_x, mean_x, var_x)  # (f_l,f_int),(f_int,)
    wp_f, bp_f = _fold_conv_bn(wp, bp, gamma_p, beta_p, mean_p, var_p)  # (f_int,1),(1,)

    return dict(
        # unfused, channel-minor params for the pure-JAX reference
        wg=wg_f, bg=bg_f[None, :], wx=wx_f, bx=bx_f[None, :],
        wp=wp_f, bp=bp_f[None, :],
        # fused, channel-major params consumed by the Pallas kernel
        wgx=jnp.concatenate([wg_f.T, wx_f.T], axis=1),   # (f_int, f_g + f_l)
        bgx=(bg_f + bx_f)[:, None],                      # (f_int, 1)
        wp_col=wp_f,                                     # (f_int, 1)
        bp_11=bp_f[None, :],                             # (1, 1)
    )


def attention_block_ref(g, x, params):
    """Pure-JAX reference (same folded-BN semantics) for sanity checking."""
    N, Cg, H, W = g.shape
    _, Cl, _, _ = x.shape
    gf = jnp.transpose(g, (0, 2, 3, 1)).reshape(-1, Cg).astype(jnp.float32)
    xf = jnp.transpose(x, (0, 2, 3, 1)).reshape(-1, Cl).astype(jnp.float32)
    g1 = gf @ params["wg"] + params["bg"]
    x1 = xf @ params["wx"] + params["bx"]
    h = jnp.maximum(g1 + x1, 0.0)
    psi = jax.nn.sigmoid(h @ params["wp"] + params["bp"])
    out = (psi * xf).reshape(N, H, W, Cl)
    return jnp.transpose(out, (0, 3, 1, 2)).astype(x.dtype)


if __name__ == "__main__":
    f_g, f_l, f_int = 4, 4, 8
    N, H, W = 2, 16, 16

    key = jax.random.PRNGKey(0)
    kg, kx, kp = jax.random.split(key, 3)
    g = jax.random.normal(kg, (N, f_g, H, W), jnp.float32)
    x = jax.random.normal(kx, (N, f_l, H, W), jnp.float32)
    params = init_params(kp, f_g, f_l, f_int)

    ref = attention_block_ref(g, x, params)

    # f32-streaming path: tight check against the f32 reference.
    out_f32 = jax.block_until_ready(
        attention_block_pallas(g, x, params, stream_dtype=jnp.float32))
    assert out_f32.shape == (N, f_l, H, W)
    assert jnp.allclose(out_f32, ref, atol=1e-5, rtol=1e-5), "f32 mismatch vs JAX reference"

    # Default bf16-streaming path (bandwidth-optimized); f32 math inside the kernel.
    out_bf16 = jax.block_until_ready(attention_block_pallas(g, x, params))
    assert out_bf16.shape == (N, f_l, H, W)
    assert jnp.allclose(out_bf16, ref, atol=5e-2, rtol=5e-2), "bf16 mismatch vs JAX reference"

    print("KERNEL_OK")
</pallas_src>

<mosaic_0001>
module attributes {stable_mosaic.version = 11 : i64} {
  func.func @_attention_block_kernel(%arg0: i32, %arg1: memref<8x512xf32, #tpu.memory_space<vmem>>, %arg2: memref<8x8xf32, #tpu.memory_space<vmem>>, %arg3: memref<8x1xf32, #tpu.memory_space<vmem>>, %arg4: memref<8x1xf32, #tpu.memory_space<vmem>>, %arg5: memref<1x1xf32, #tpu.memory_space<vmem>>, %arg6: memref<4x512xf32, #tpu.memory_space<vmem>>) attributes {dimension_semantics = [#tpu.dimension_semantics<parallel>], iteration_bounds = array<i64: 1>, scalar_prefetch = 0 : i64, scratch_operands = 0 : i64, tpu.core_type = #tpu.core_type<tc>, window_params = [{transform_indices = @transform_0, window_bounds = array<i64: 8, 512>}, {pipeline_mode = #tpu.pipeline_mode<synchronous>, transform_indices = @transform_1, window_bounds = array<i64: 8, 8>}, {pipeline_mode = #tpu.pipeline_mode<synchronous>, transform_indices = @transform_2, window_bounds = array<i64: 8, 1>}, {pipeline_mode = #tpu.pipeline_mode<synchronous>, transform_indices = @transform_3, window_bounds = array<i64: 8, 1>}, {pipeline_mode = #tpu.pipeline_mode<synchronous>, transform_indices = @transform_4, window_bounds = array<i64: 1, 1>}, {transform_indices = @transform_5, window_bounds = array<i64: 4, 512>}]} {
    %c0 = arith.constant 0 : index
    %c0_0 = arith.constant 0 : index
    %0 = vector.load %arg1[%c0, %c0_0] : memref<8x512xf32, #tpu.memory_space<vmem>>, vector<8x512xf32>
    %1 = vector.extract_strided_slice %0 {offsets = [4, 0], sizes = [4, 512], strides = [1, 1]} : vector<8x512xf32> to vector<4x512xf32>
    %c0_1 = arith.constant 0 : index
    %c0_2 = arith.constant 0 : index
    %2 = vector.load %arg2[%c0_1, %c0_2] : memref<8x8xf32, #tpu.memory_space<vmem>>, vector<8x8xf32>
    %cst = arith.constant dense<0.000000e+00> : vector<8x512xf32>
    %3 = tpu.matmul %2, %0, %cst {dimension_numbers = #tpu.dot_dimension_numbers<[1], [0], [0], [1], [0, 0, 1, 1], [], []>} : vector<8x8xf32>, vector<8x512xf32>, vector<8x512xf32> -> vector<8x512xf32>
    %c0_3 = arith.constant 0 : index
    %c0_4 = arith.constant 0 : index
    %4 = vector.load %arg3[%c0_3, %c0_4] : memref<8x1xf32, #tpu.memory_space<vmem>>, vector<8x1xf32>
    %5 = vector.broadcast %4 : vector<8x1xf32> to vector<8x512xf32>
    %6 = arith.addf %3, %5 : vector<8x512xf32>
    %cst_5 = arith.constant 0.000000e+00 : f32
    %7 = vector.broadcast %cst_5 : f32 to vector<8x512xf32>
    %8 = arith.maximumf %6, %7 : vector<8x512xf32>
    %c0_6 = arith.constant 0 : index
    %c0_7 = arith.constant 0 : index
    %9 = vector.load %arg4[%c0_6, %c0_7] : memref<8x1xf32, #tpu.memory_space<vmem>>, vector<8x1xf32>
    %10 = vector.broadcast %9 : vector<8x1xf32> to vector<8x512xf32>
    %11 = arith.mulf %8, %10 : vector<8x512xf32>
    %cst_8 = arith.constant dense<0.000000e+00> : vector<512xf32>
    %12 = vector.multi_reduction <add>, %11, %cst_8 [0] : vector<8x512xf32> to vector<512xf32>
    %13 = vector.shape_cast %12 : vector<512xf32> to vector<1x512xf32>
    %c0_9 = arith.constant 0 : index
    %c0_10 = arith.constant 0 : index
    %14 = vector.load %arg5[%c0_9, %c0_10] : memref<1x1xf32, #tpu.memory_space<vmem>>, vector<1x1xf32>
    %15 = vector.broadcast %14 : vector<1x1xf32> to vector<1x512xf32>
    %16 = arith.addf %13, %15 : vector<1x512xf32>
    %17 = arith.negf %16 : vector<1x512xf32>
    %18 = math.exp %17 : vector<1x512xf32>
    %cst_11 = arith.constant 1.000000e+00 : f32
    %19 = vector.broadcast %cst_11 : f32 to vector<1x512xf32>
    %20 = arith.addf %19, %18 : vector<1x512xf32>
    %21 = arith.divf %19, %20 : vector<1x512xf32>
    %22 = vector.broadcast %21 : vector<1x512xf32> to vector<4x512xf32>
    %23 = arith.mulf %22, %1 : vector<4x512xf32>
    %c0_12 = arith.constant 0 : index
    %c0_13 = arith.constant 0 : index
    %24 = vector.load %arg6[%c0_12, %c0_13] : memref<4x512xf32, #tpu.memory_space<vmem>>, vector<4x512xf32>
    tpu.vector_store %arg6[%c0_12, %c0_13], %23 {strides = array<i32>} : memref<4x512xf32, #tpu.memory_space<vmem>>, vector<4x512xf32>,
    return
  }
  func.func @transform_0(%arg0: i32) -> (i32, i32) {
    %c0_i32 = arith.constant 0 : i32
    %c0_i32_0 = arith.constant 0 : i32
    return %c0_i32, %arg0 : i32, i32
  }
  func.func @transform_1(%arg0: i32) -> (i32, i32) {
    %c0_i32 = arith.constant 0 : i32
    %c0_i32_0 = arith.constant 0 : i32
    %c0_i32_1 = arith.constant 0 : i32
    return %c0_i32, %c0_i32_0 : i32, i32
  }
  func.func @transform_2(%arg0: i32) -> (i32, i32) {
    %c0_i32 = arith.constant 0 : i32
    %c0_i32_0 = arith.constant 0 : i32
    %c0_i32_1 = arith.constant 0 : i32
    return %c0_i32, %c0_i32_0 : i32, i32
  }
  func.func @transform_3(%arg0: i32) -> (i32, i32) {
    %c0_i32 = arith.constant 0 : i32
    %c0_i32_0 = arith.constant 0 : i32
    %c0_i32_1 = arith.constant 0 : i32
    return %c0_i32, %c0_i32_0 : i32, i32
  }
  func.func @transform_4(%arg0: i32) -> (i32, i32) {
    %c0_i32 = arith.constant 0 : i32
    %c0_i32_0 = arith.constant 0 : i32
    %c0_i32_1 = arith.constant 0 : i32
    return %c0_i32, %c0_i32_0 : i32, i32
  }
  func.func @transform_5(%arg0: i32) -> (i32, i32) {
    %c0_i32 = arith.constant 0 : i32
    %c0_i32_0 = arith.constant 0 : i32
    return %c0_i32, %arg0 : i32, i32
  }
}

</mosaic_0001>

<bundles_post_ra>
// kernel: tpu_custom_call.1
= control target key start
LH: loop header
LB: loop body
LE: loop exit
PB: predicated region body
PF: predicated region fallthrough
CT: control target
= control target key end

     0   :  { %s442_s0 = inlined_call_operand.hbm [shape: f32[8,512], index: 0, kind: input, shape index: {}]   ;;  %s443_s1 = inlined_call_operand.vmem [shape: f32[8,8], index: 1, kind: input, shape index: {}]   ;;  %s444_s2 = inlined_call_operand.vmem [shape: f32[8,1], index: 2, kind: input, shape index: {}]   ;;  %s445_s3 = inlined_call_operand.vmem [shape: f32[8,1], index: 3, kind: input, shape index: {}]   ;;  %s446_s4 = inlined_call_operand.<no memory space> [shape: f32[1,1], index: 4, kind: input, shape index: {}]   ;;  %s447_s5 = inlined_call_operand.hbm [shape: f32[4,512], index: 5, kind: output, shape index: {}]  }
   0x1   :  { %v10_v0 = vstv %s446_s4 }
   0x2   :  { %11 = vst [vmem:[#allocation2] sm:$0x1] %v10_v0 }
   0x3   :  { %12 = vsyncpa [#allocation4], 0 }
   0x4   :  { %13 = vsyncpa [#allocation5], 0  ;;  %s19_s22 = sshll.u32 %s442_s0, 4  ;;  %s375_s23 = smov [#allocation3]   ;;  %s20_s22 = int_to_ptr.hbm [resolvable:$true] %s19_s22 }
   0x5   :  { %s21_s24 = sshll.u32 %s375_s23, 4  ;;  %s22_s24 = int_to_ptr.vmem [resolvable:$true] %s21_s24 }
   0x6   :  { %24 = dma.hbm_to_vmem [thread:$0]  %s20_s22, 512, %s22_s24, [#allocation4]  }
   0x7   :  { %371 = dma.done.wait [#allocation4], 512  }
   0x8   :  { %372 = vsyncadd [#allocation4], 4294966784  ;;  %v376_v1 = vmov 0   ;;  %v414_v2 = vld [vmem:[#allocation3] sm:$0xff]  ;;  %v416_v3 = vld [vmem:[#allocation3 + $0x8] sm:$0xff]  ;;  %vm48_vm0 = vcmask 64512  }
   0x9   :  { %305 = vset.pattern.permute.xlu0 %v376_v1  ;;  %306 = vset.pattern.permute.xlu1 %v376_v1  ;;  %v418_v4 = vld [vmem:[#allocation3 + $0x10] sm:$0xff]  ;;  %v422_v5 = vld [vmem:[#allocation3 + $0x18] sm:$0xff]  ;;  %s284_s30 = sshll.u32 %s447_s5, 4  ;;  %s285_s30 = int_to_ptr.hbm [resolvable:$true] %s284_s30 }
   0xa   :  { %67 = vmatpush.msra.mxu0 %v414_v2  ;;  %87 = vmatpush.msra.mxu1 %v416_v3  ;;  %v41_v6 = vld [vmem:[%s443_s1] sm:$0xff]  ;;  %v170_v8 = vld [vmem:[#allocation2] sm:$0x1]  ;;  %s377_s1 = smov [#allocation6]  }
   0xb   :  { %107 = vmatpush.msra.mxu2 %v418_v4  ;;  %127 = vmatpush.msra.mxu3 %v422_v5  ;;  %v42_v7 = vld [vmem:[%s444_s2] sm:$0xff]  ;;  %s282_s2 = sshll.u32 %s377_s1, 4  ;;  %s283_s2 = int_to_ptr.vmem [resolvable:$true] %s282_s2 }
   0xc   :  { %294 = vmatmul.msk.f32.vlgmr.msra.gmra.mxu0 %vm48_vm0, %v41_v6  ;;  %295 = vmatmul.msk.f32.vlgmr.msra.gmra.mxu1 %vm48_vm0, %v41_v6  ;;  %v136_v9 = vld [vmem:[%s445_s3] sm:$0xff] }
   0xd   :  { %296 = vmatmul.msk.f32.vlgmr.msra.gmra.mxu2 %vm48_vm0, %v41_v6  ;;  %297 = vmatmul.msk.f32.vlgmr.msra.gmra.mxu3 %vm48_vm0, %v41_v6 }
   0xe   :  { %45 = vperm.xlu0 %305, %v42_v7   ;;  %173 = vperm.xlu1 %306, %v170_v8  }
  0x16   :  { %139 = vperm.xlu0 %305, %v136_v9  }
  0x80   :  { %v46_v10 = vpop.permute.xlu0 %45  ;;  %v174_v34 = vpop.permute.xlu1 %173 }
  0x81   :  { %v176_v41 = vperm.slane %v174_v34, 0 }
  0x88   :  { %v140_v17 = vpop.permute.xlu0 %139 }
  0x89   :  { %v69_v11 = vpop.f32.mrf.mxu0  ;;  %v89_v12 = vpop.f32.mrf.mxu1 }
  0x8a   :  { %v70_v13 = vadd.f32 %v69_v11, %v46_v10  ;;  %v90_v14 = vadd.f32 %v89_v12, %v46_v10 }
  0x8c   :  { %v132_v15 = vmax.f32 %v70_v13, 0.0  ;;  %v133_v16 = vmax.f32 %v90_v14, 0.0 }
  0x8e   :  { %v142_v18 = vmul.f32 %v140_v17, %v132_v15  ;;  %v143_v19 = vmul.f32 %v140_v17, %v133_v16 }
  0x90   :  { %v146_v20 = vrot.slane %v142_v18, 4  ;;  %v152_v21 = vrot.slane %v143_v19, 4  ;;  %v109_v22 = vpop.f32.mrf.mxu2  ;;  %v129_v23 = vpop.f32.mrf.mxu3 }
  0x91   :  { %v110_v24 = vadd.f32 %v109_v22, %v46_v10  ;;  %v130_v25 = vadd.f32 %v129_v23, %v46_v10 }
  0x92   :  { %v147_v26 = vadd.f32 %v146_v20, %v142_v18  ;;  %v153_v27 = vadd.f32 %v152_v21, %v143_v19 }
  0x93   :  { %v134_v28 = vmax.f32 %v110_v24, 0.0  ;;  %v135_v29 = vmax.f32 %v130_v25, 0.0 }
  0x94   :  { %v148_v30 = vrot.slane %v147_v26, 2  ;;  %v154_v31 = vrot.slane %v153_v27, 2 }
  0x95   :  { %v144_v32 = vmul.f32 %v140_v17, %v134_v28  ;;  %v145_v33 = vmul.f32 %v140_v17, %v135_v29 }
  0x96   :  { %v149_v35 = vadd.f32 %v148_v30, %v147_v26  ;;  %v155_v36 = vadd.f32 %v154_v31, %v153_v27 }
  0x97   :  { %v158_v37 = vrot.slane %v144_v32, 4  ;;  %v164_v38 = vrot.slane %v145_v33, 4 }
  0x98   :  { %v150_v39 = vrot.slane %v149_v35, 1  ;;  %v156_v40 = vrot.slane %v155_v36, 1 }
  0x99   :  { %v159_v42 = vadd.f32 %v158_v37, %v144_v32  ;;  %v165_v43 = vadd.f32 %v164_v38, %v145_v33 }
  0x9a   :  { %v151_v44 = vadd.f32 %v150_v39, %v149_v35  ;;  %v157_v45 = vadd.f32 %v156_v40, %v155_v36 }
  0x9b   :  { %v160_v46 = vrot.slane %v159_v42, 2  ;;  %v166_v47 = vrot.slane %v165_v43, 2 }
  0x9c   :  { %v177_v48 = vadd.f32 %v176_v41, %v151_v44  ;;  %v178_v49 = vadd.f32 %v176_v41, %v157_v45 }
  0x9d   :  { %v161_v50 = vadd.f32 %v160_v46, %v159_v42  ;;  %v167_v51 = vadd.f32 %v166_v47, %v165_v43 }
  0x9e   :  { %v298_v52 = vmul.f32 -1.442695, %v177_v48  ;;  %v299_v53 = vmul.f32 -1.442695, %v178_v49 }
  0x9f   :  { %v162_v54 = vrot.slane %v161_v50, 1  ;;  %v168_v55 = vrot.slane %v167_v51, 1 }
  0xa0   :  { %307 = vpow2.f32 %v298_v52 }
  0xa1   :  { %v163_v56 = vadd.f32 %v162_v54, %v161_v50  ;;  %v169_v57 = vadd.f32 %v168_v55, %v167_v51  ;;  %309 = vpow2.f32 %v299_v53 }
  0xa3   :  { %v179_v58 = vadd.f32 %v176_v41, %v163_v56  ;;  %v180_v59 = vadd.f32 %v176_v41, %v169_v57 }
  0xa5   :  { %v300_v60 = vmul.f32 -1.442695, %v179_v58  ;;  %v301_v61 = vmul.f32 -1.442695, %v180_v59 }
  0xa6   :  { %v308_v62 = vpop.eup %307 }
  0xa7   :  { %v310_v63 = vpop.eup %309  ;;  %311 = vpow2.f32 %v300_v60  ;;  %v193_v0 = vadd.f32 1.0, %v308_v62 }
  0xa8   :  { %313 = vpow2.f32 %v301_v61  ;;  %v194_v1 = vadd.f32 1.0, %v310_v63 }
  0xa9   :  { %315 = vrcp.f32 %v193_v0  ;;  %v206_v15 = vand.u32 2147483647, %v193_v0  ;;  %v208_v16 = vand.u32 2147483648, %v193_v0  ;;  %vm202_vm3 = vweird.f32 %v193_v0 }
  0xaa   :  { %317 = vrcp.f32 %v194_v1  ;;  %v221_v19 = vand.u32 2147483647, %v194_v1  ;;  %v223_v20 = vand.u32 2147483648, %v194_v1  ;;  %vm217_vm5 = vweird.f32 %v194_v1 }
  0xab   :  { %v209_v24 = vor.u32 1.1754944e-38, %v208_v16  ;;  %vm207_vm6 = vcmp.eq.f32.partialorder %v206_v15, 8.507059e+37 }
  0xac   :  { %vm222_vm8 = vcmp.eq.f32.partialorder %v221_v19, 8.507059e+37  ;;  %v224_v29 = vor.u32 1.1754944e-38, %v223_v20 }
  0xad   :  { %v312_v6 = vpop.eup %311 }
  0xae   :  { %v314_v7 = vpop.eup %313  ;;  %v195_v8 = vadd.f32 1.0, %v312_v6 }
  0xaf   :  { %v316_v9 = vpop.eup %315  ;;  %v196_v10 = vadd.f32 1.0, %v314_v7 }
  0xb0   :  { %v318_v11 = vpop.eup %317  ;;  %v198_v12 = vmul.f32 %v316_v9, %v193_v0  ;;  %319 = vrcp.f32 %v195_v8  ;;  %vm203_vm1 = vweird.f32 %v316_v9  ;;  %v236_v35 = vand.u32 2147483647, %v195_v8 }
  0xb1   :  { %v213_v13 = vmul.f32 %v318_v11, %v194_v1  ;;  %321 = vrcp.f32 %v196_v10  ;;  %vm218_vm2 = vweird.f32 %v318_v11  ;;  %vm204_vm4 = vmor %vm202_vm3, %vm203_vm1  ;;  %v238_v36 = vand.u32 2147483648, %v195_v8 }
  0xb2   :  { %v199_v14 = vsub.f32 1.0, %v198_v12  ;;  %vm219_vm7 = vmor %vm217_vm5, %vm218_vm2  ;;  %vm232_vm10 = vweird.f32 %v195_v8  ;;  %v253_v41 = vand.u32 2147483648, %v196_v10  ;;  %v251_v44 = vand.u32 2147483647, %v196_v10 }
  0xb3   :  { %v214_v17 = vsub.f32 1.0, %v213_v13  ;;  %v239_v45 = vor.u32 1.1754944e-38, %v238_v36  ;;  %vm237_vm13 = vcmp.eq.f32.partialorder %v236_v35, 8.507059e+37  ;;  %vm247_vm14 = vweird.f32 %v196_v10 }
  0xb4   :  { %v200_v18 = vmul.f32 %v316_v9, %v199_v14  ;;  %v254_v48 = vor.u32 1.1754944e-38, %v253_v41  ;;  %vm252_vm0 = vcmp.eq.f32.partialorder %v251_v44, 8.507059e+37 }
  0xb5   :  { %v215_v21 = vmul.f32 %v318_v11, %v214_v17 }
  0xb6   :  { %v320_v22 = vpop.eup %319  ;;  %v201_v23 = vadd.f32 %v316_v9, %v200_v18 }
  0xb7   :  { %v216_v25 = vadd.f32 %v318_v11, %v215_v21  ;;  %v228_v26 = vmul.f32 %v320_v22, %v195_v8  ;;  %v322_v27 = vpop.eup %321  ;;  %vm233_vm9 = vweird.f32 %v320_v22 }
  0xb8   :  { %v205_v28 = vsel %vm204_vm4, %v316_v9, %v201_v23  ;;  %v243_v33 = vmul.f32 %v322_v27, %v196_v10  ;;  %vm248_vm11 = vweird.f32 %v322_v27  ;;  %vm234_vm12 = vmor %vm232_vm10, %vm233_vm9 }
  0xb9   :  { %v210_v30 = vsel %vm207_vm6, %v209_v24, %v205_v28  ;;  %v220_v31 = vsel %vm219_vm7, %v318_v11, %v216_v25  ;;  %v229_v32 = vsub.f32 1.0, %v228_v26  ;;  %vm249_vm15 = vmor %vm247_vm14, %vm248_vm11 }
  0xba   :  { %v225_v34 = vsel %vm222_vm8, %v224_v29, %v220_v31  ;;  %v257_v37 = vmul.f32 %v210_v30, %v414_v2  ;;  %v244_v39 = vsub.f32 1.0, %v243_v33 }
  0xbb   :  { %v230_v38 = vmul.f32 %v320_v22, %v229_v32  ;;  %v258_v40 = vmul.f32 %v225_v34, %v416_v3 }
  0xbc   :  { %265 = vst.sshfl [vmem:[#allocation1] sm:$0xff pattern:$0x75316420] %v257_v37  ;;  %v245_v43 = vmul.f32 %v322_v27, %v244_v39 }
  0xbd   :  { %v231_v42 = vadd.f32 %v320_v22, %v230_v38  ;;  %266 = vst.sshfl [vmem:[#allocation1 + $0x8] sm:$0xff pattern:$0x75316420] %v258_v40 }
  0xbe   :  { %v246_v47 = vadd.f32 %v322_v27, %v245_v43 }
  0xbf   :  { %v235_v46 = vsel %vm234_vm12, %v320_v22, %v231_v42 }
  0xc0   :  { %v240_v2 = vsel %vm237_vm13, %v239_v45, %v235_v46  ;;  %v250_v49 = vsel %vm249_vm15, %v322_v27, %v246_v47 }
  0xc1   :  { %v259_v3 = vmul.f32 %v240_v2, %v418_v4  ;;  %v255_v50 = vsel %vm252_vm0, %v254_v48, %v250_v49 }
  0xc2   :  { %v260_v51 = vmul.f32 %v255_v50, %v422_v5 }
  0xc3   :  { %267 = vst.sshfl [vmem:[#allocation1 + $0x10] sm:$0xff pattern:$0x75316420] %v259_v3 }
  0xc4   :  { %v270_v52 = vld [vmem:[#allocation1 + $0x1] ss:$2 sm:$0xff]  ;;  %268 = vst.sshfl [vmem:[#allocation1 + $0x18] sm:$0xff pattern:$0x75316420] %v260_v51 }
  0xc5   :  { %275 = vst [vmem:[#allocation6] sm:$0xff] %v270_v52 }
  0xcb   :  { %v272_v53 = vld [vmem:[#allocation1 + $0x11] ss:$2 sm:$0xff] }
  0xcc   :  { %276 = vst [vmem:[#allocation6 + $0x8] sm:$0xff] %v272_v53 }
  0xcd   :  { %287 = dma.vmem_to_hbm [thread:$0]  %s283_s2, 256, %s285_s30, [#allocation5]  }
  0xce   :  { %373 = dma.done.wait [#allocation5], 256  }
  0xcf   :  { %374 = vsyncadd [#allocation5], 4294967040 }
  0xd0   :  { %292 = vsyncpa [#allocation4], 1 }
  0xd1   :  { %293 = vsyncpa [#allocation5], 1 }

</bundles_post_ra>
